<compile_context>
chip_gen: v6e
topology: v6e:2x2x1
jax: 0.10.0
libtpu: 0.0.40
codegen_flags: <defaults>
</compile_context>

<pallas_src>
import functools

import jax
import jax.numpy as jnp
import numpy as np
from jax.experimental import pallas as pl
from jax.experimental.pallas import tpu as pltpu


def _stfg_kernel(key_ref, roi_ref, fg_ref, out_ref, *, max_sel: int):
    """key_ref: [H, W] int32 distinct random keys (0..H*W-1).
       roi_ref, fg_ref, out_ref: [H, W] float32. out aliases fg."""
    H, W = roi_ref.shape
    sent = jnp.int32(H * W)  # strictly greater than any real key

    # Inactive (roi == 0) positions carry the sentinel; picked positions are
    # overwritten with the sentinel as well, so `cur` alone tracks the
    # remaining candidate set.
    cur0 = jnp.where(roi_ref[...] != 0.0, key_ref[...], sent)
    sel0 = jnp.zeros((H, W), jnp.bool_)

    def body(_, carry):
        selected, cur = carry
        m = jnp.min(cur)                       # global min key (scalar)
        # `cur < sent` keeps the pick empty once all candidates are exhausted
        # (i.e. when n_fg < max_sel); keys are distinct so at most one hit.
        pick = (cur == m) & (cur < sent)
        return selected | pick, jnp.where(pick, sent, cur)

    selected, _ = jax.lax.fori_loop(0, max_sel, body, (sel0, cur0), unroll=True)

    # fg[sampled positions] = 1 ; everything else unchanged.
    out_ref[...] = jnp.where(selected, jnp.float32(1.0), fg_ref[...])


def stfg(roi: jax.Array, fg: jax.Array, rng_key: jax.Array, max_: int) -> jax.Array:
    """Pallas equivalent of _STFG(max_).forward(roi, fg).

    rng_key: a jax.random PRNG key (replaces torch's global RNG stream).
    """
    H, W = roi.shape
    # Distinct uniform-random keys per position: a random permutation of the
    # flat indices. Restricted to the roi-nonzero positions this induces an
    # exactly uniform random order -> taking the max_ smallest == uniform
    # sampling without replacement.
    # TODO(synk): RNG stream differs from torch.multinomial (different PRNG);
    # the distributional semantics are preserved.
    keys = jax.random.permutation(rng_key, H * W).astype(jnp.int32).reshape(H, W)

    kernel = functools.partial(_stfg_kernel, max_sel=int(max_))
    return pl.pallas_call(
        kernel,
        out_shape=jax.ShapeDtypeStruct((H, W), fg.dtype),
        in_specs=[
            pl.BlockSpec(memory_space=pltpu.MemorySpace.VMEM),  # keys [H, W]
            pl.BlockSpec(memory_space=pltpu.MemorySpace.VMEM),  # roi  [H, W]
            pl.BlockSpec(memory_space=pltpu.MemorySpace.VMEM),  # fg   [H, W]
        ],
        out_specs=pl.BlockSpec(memory_space=pltpu.MemorySpace.VMEM),
        input_output_aliases={2: 0},  # out aliases fg (in-place style update)
    )(keys, roi, fg)


if __name__ == "__main__":
    H, W = 16, 128          # small spatial map; lane-friendly last dim
    max_ = 12               # module hyper-parameter `max_`

    k0, k1, k2 = jax.random.split(jax.random.PRNGKey(0), 3)
    roi = (jax.random.uniform(k0, (H, W)) > 0.7).astype(jnp.float32)
    fg = jax.random.uniform(k1, (H, W), minval=0.0, maxval=0.5).astype(jnp.float32)

    # snapshot inputs BEFORE the (aliasing) call for the reference checks
    roi_np = np.asarray(roi)
    fg_np = np.asarray(fg)

    out = stfg(roi, fg, rng_key=k2, max_=max_)
    out = jax.block_until_ready(out)
    out_np = np.asarray(out)

    # sanity checks against the reference semantics
    changed = out_np != fg_np
    n_fg = int((roi_np != 0).sum())
    assert int(changed.sum()) == min(max_, n_fg), "wrong number of sampled positions"
    assert np.all(roi_np[changed] != 0), "sampled a position outside roi"
    assert np.all(out_np[changed] == 1.0), "sampled positions must be set to 1"
    assert np.allclose(out_np[~changed], fg_np[~changed]), "non-sampled fg changed"

    print("KERNEL_OK")
</pallas_src>

<mosaic_0001>
module attributes {stable_mosaic.version = 11 : i64} {
  func.func @_stfg_kernel(%arg0: memref<16x128xi32, #tpu.memory_space<vmem>>, %arg1: memref<16x128xf32, #tpu.memory_space<vmem>>, %arg2: memref<16x128xf32, #tpu.memory_space<vmem>>, %arg3: memref<16x128xf32, #tpu.memory_space<vmem>>) attributes {dimension_semantics = [], scalar_prefetch = 0 : i64, scratch_operands = 0 : i64, tpu.core_type = #tpu.core_type<tc>} {
    %c0 = arith.constant 0 : index
    %c0_0 = arith.constant 0 : index
    %0 = vector.load %arg1[%c0, %c0_0] : memref<16x128xf32, #tpu.memory_space<vmem>>, vector<16x128xf32>
    %cst = arith.constant 0.000000e+00 : f32
    %1 = vector.broadcast %cst : f32 to vector<16x128xf32>
    %2 = arith.cmpf one, %0, %1 : vector<16x128xf32>
    %c0_1 = arith.constant 0 : index
    %c0_2 = arith.constant 0 : index
    %3 = vector.load %arg0[%c0_1, %c0_2] : memref<16x128xi32, #tpu.memory_space<vmem>>, vector<16x128xi32>
    %c2048_i32 = arith.constant 2048 : i32
    %4 = vector.broadcast %c2048_i32 : i32 to vector<16x128xi32>
    %5 = arith.select %2, %3, %4 : vector<16x128xi1>, vector<16x128xi32>
    %false = arith.constant false
    %6 = vector.broadcast %false : i1 to vector<16x128xi1>
    %c2048_i32_3 = arith.constant 2048 : i32
    %c0_i32 = arith.constant 0 : i32
    %7 = vector.shape_cast %5 : vector<16x128xi32> to vector<1x16x128xi32>
    %cst_4 = arith.constant dense<2147483647> : vector<1xi32>
    %8 = vector.multi_reduction <minsi>, %7, %cst_4 [1, 2] : vector<1x16x128xi32> to vector<1xi32>
    %9 = vector.shape_cast %8 : vector<1xi32> to vector<1x1x1xi32>
    %10 = vector.extract %9[0, 0, 0] : i32 from vector<1x1x1xi32>
    %11 = vector.broadcast %10 : i32 to vector<16x128xi32>
    %12 = arith.cmpi eq, %5, %11 : vector<16x128xi32>
    %13 = vector.broadcast %c2048_i32_3 : i32 to vector<16x128xi32>
    %14 = arith.cmpi slt, %5, %13 : vector<16x128xi32>
    %15 = arith.andi %12, %14 : vector<16x128xi1>
    %16 = arith.ori %6, %15 : vector<16x128xi1>
    %17 = vector.broadcast %c2048_i32_3 : i32 to vector<16x128xi32>
    %18 = arith.select %15, %17, %5 : vector<16x128xi1>, vector<16x128xi32>
    %c1_i32 = arith.constant 1 : i32
    %19 = vector.shape_cast %18 : vector<16x128xi32> to vector<1x16x128xi32>
    %cst_5 = arith.constant dense<2147483647> : vector<1xi32>
    %20 = vector.multi_reduction <minsi>, %19, %cst_5 [1, 2] : vector<1x16x128xi32> to vector<1xi32>
    %21 = vector.shape_cast %20 : vector<1xi32> to vector<1x1x1xi32>
    %22 = vector.extract %21[0, 0, 0] : i32 from vector<1x1x1xi32>
    %23 = vector.broadcast %22 : i32 to vector<16x128xi32>
    %24 = arith.cmpi eq, %18, %23 : vector<16x128xi32>
    %25 = vector.broadcast %c2048_i32_3 : i32 to vector<16x128xi32>
    %26 = arith.cmpi slt, %18, %25 : vector<16x128xi32>
    %27 = arith.andi %24, %26 : vector<16x128xi1>
    %28 = arith.ori %16, %27 : vector<16x128xi1>
    %29 = vector.broadcast %c2048_i32_3 : i32 to vector<16x128xi32>
    %30 = arith.select %27, %29, %18 : vector<16x128xi1>, vector<16x128xi32>
    %c2_i32 = arith.constant 2 : i32
    %31 = vector.shape_cast %30 : vector<16x128xi32> to vector<1x16x128xi32>
    %cst_6 = arith.constant dense<2147483647> : vector<1xi32>
    %32 = vector.multi_reduction <minsi>, %31, %cst_6 [1, 2] : vector<1x16x128xi32> to vector<1xi32>
    %33 = vector.shape_cast %32 : vector<1xi32> to vector<1x1x1xi32>
    %34 = vector.extract %33[0, 0, 0] : i32 from vector<1x1x1xi32>
    %35 = vector.broadcast %34 : i32 to vector<16x128xi32>
    %36 = arith.cmpi eq, %30, %35 : vector<16x128xi32>
    %37 = vector.broadcast %c2048_i32_3 : i32 to vector<16x128xi32>
    %38 = arith.cmpi slt, %30, %37 : vector<16x128xi32>
    %39 = arith.andi %36, %38 : vector<16x128xi1>
    %40 = arith.ori %28, %39 : vector<16x128xi1>
    %41 = vector.broadcast %c2048_i32_3 : i32 to vector<16x128xi32>
    %42 = arith.select %39, %41, %30 : vector<16x128xi1>, vector<16x128xi32>
    %c3_i32 = arith.constant 3 : i32
    %43 = vector.shape_cast %42 : vector<16x128xi32> to vector<1x16x128xi32>
    %cst_7 = arith.constant dense<2147483647> : vector<1xi32>
    %44 = vector.multi_reduction <minsi>, %43, %cst_7 [1, 2] : vector<1x16x128xi32> to vector<1xi32>
    %45 = vector.shape_cast %44 : vector<1xi32> to vector<1x1x1xi32>
    %46 = vector.extract %45[0, 0, 0] : i32 from vector<1x1x1xi32>
    %47 = vector.broadcast %46 : i32 to vector<16x128xi32>
    %48 = arith.cmpi eq, %42, %47 : vector<16x128xi32>
    %49 = vector.broadcast %c2048_i32_3 : i32 to vector<16x128xi32>
    %50 = arith.cmpi slt, %42, %49 : vector<16x128xi32>
    %51 = arith.andi %48, %50 : vector<16x128xi1>
    %52 = arith.ori %40, %51 : vector<16x128xi1>
    %53 = vector.broadcast %c2048_i32_3 : i32 to vector<16x128xi32>
    %54 = arith.select %51, %53, %42 : vector<16x128xi1>, vector<16x128xi32>
    %c4_i32 = arith.constant 4 : i32
    %55 = vector.shape_cast %54 : vector<16x128xi32> to vector<1x16x128xi32>
    %cst_8 = arith.constant dense<2147483647> : vector<1xi32>
    %56 = vector.multi_reduction <minsi>, %55, %cst_8 [1, 2] : vector<1x16x128xi32> to vector<1xi32>
    %57 = vector.shape_cast %56 : vector<1xi32> to vector<1x1x1xi32>
    %58 = vector.extract %57[0, 0, 0] : i32 from vector<1x1x1xi32>
    %59 = vector.broadcast %58 : i32 to vector<16x128xi32>
    %60 = arith.cmpi eq, %54, %59 : vector<16x128xi32>
    %61 = vector.broadcast %c2048_i32_3 : i32 to vector<16x128xi32>
    %62 = arith.cmpi slt, %54, %61 : vector<16x128xi32>
    %63 = arith.andi %60, %62 : vector<16x128xi1>
    %64 = arith.ori %52, %63 : vector<16x128xi1>
    %65 = vector.broadcast %c2048_i32_3 : i32 to vector<16x128xi32>
    %66 = arith.select %63, %65, %54 : vector<16x128xi1>, vector<16x128xi32>
    %c5_i32 = arith.constant 5 : i32
    %67 = vector.shape_cast %66 : vector<16x128xi32> to vector<1x16x128xi32>
    %cst_9 = arith.constant dense<2147483647> : vector<1xi32>
    %68 = vector.multi_reduction <minsi>, %67, %cst_9 [1, 2] : vector<1x16x128xi32> to vector<1xi32>
    %69 = vector.shape_cast %68 : vector<1xi32> to vector<1x1x1xi32>
    %70 = vector.extract %69[0, 0, 0] : i32 from vector<1x1x1xi32>
    %71 = vector.broadcast %70 : i32 to vector<16x128xi32>
    %72 = arith.cmpi eq, %66, %71 : vector<16x128xi32>
    %73 = vector.broadcast %c2048_i32_3 : i32 to vector<16x128xi32>
    %74 = arith.cmpi slt, %66, %73 : vector<16x128xi32>
    %75 = arith.andi %72, %74 : vector<16x128xi1>
    %76 = arith.ori %64, %75 : vector<16x128xi1>
    %77 = vector.broadcast %c2048_i32_3 : i32 to vector<16x128xi32>
    %78 = arith.select %75, %77, %66 : vector<16x128xi1>, vector<16x128xi32>
    %c6_i32 = arith.constant 6 : i32
    %79 = vector.shape_cast %78 : vector<16x128xi32> to vector<1x16x128xi32>
    %cst_10 = arith.constant dense<2147483647> : vector<1xi32>
    %80 = vector.multi_reduction <minsi>, %79, %cst_10 [1, 2] : vector<1x16x128xi32> to vector<1xi32>
    %81 = vector.shape_cast %80 : vector<1xi32> to vector<1x1x1xi32>
    %82 = vector.extract %81[0, 0, 0] : i32 from vector<1x1x1xi32>
    %83 = vector.broadcast %82 : i32 to vector<16x128xi32>
    %84 = arith.cmpi eq, %78, %83 : vector<16x128xi32>
    %85 = vector.broadcast %c2048_i32_3 : i32 to vector<16x128xi32>
    %86 = arith.cmpi slt, %78, %85 : vector<16x128xi32>
    %87 = arith.andi %84, %86 : vector<16x128xi1>
    %88 = arith.ori %76, %87 : vector<16x128xi1>
    %89 = vector.broadcast %c2048_i32_3 : i32 to vector<16x128xi32>
    %90 = arith.select %87, %89, %78 : vector<16x128xi1>, vector<16x128xi32>
    %c7_i32 = arith.constant 7 : i32
    %91 = vector.shape_cast %90 : vector<16x128xi32> to vector<1x16x128xi32>
    %cst_11 = arith.constant dense<2147483647> : vector<1xi32>
    %92 = vector.multi_reduction <minsi>, %91, %cst_11 [1, 2] : vector<1x16x128xi32> to vector<1xi32>
    %93 = vector.shape_cast %92 : vector<1xi32> to vector<1x1x1xi32>
    %94 = vector.extract %93[0, 0, 0] : i32 from vector<1x1x1xi32>
    %95 = vector.broadcast %94 : i32 to vector<16x128xi32>
    %96 = arith.cmpi eq, %90, %95 : vector<16x128xi32>
    %97 = vector.broadcast %c2048_i32_3 : i32 to vector<16x128xi32>
    %98 = arith.cmpi slt, %90, %97 : vector<16x128xi32>
    %99 = arith.andi %96, %98 : vector<16x128xi1>
    %100 = arith.ori %88, %99 : vector<16x128xi1>
    %101 = vector.broadcast %c2048_i32_3 : i32 to vector<16x128xi32>
    %102 = arith.select %99, %101, %90 : vector<16x128xi1>, vector<16x128xi32>
    %c8_i32 = arith.constant 8 : i32
    %103 = vector.shape_cast %102 : vector<16x128xi32> to vector<1x16x128xi32>
    %cst_12 = arith.constant dense<2147483647> : vector<1xi32>
    %104 = vector.multi_reduction <minsi>, %103, %cst_12 [1, 2] : vector<1x16x128xi32> to vector<1xi32>
    %105 = vector.shape_cast %104 : vector<1xi32> to vector<1x1x1xi32>
    %106 = vector.extract %105[0, 0, 0] : i32 from vector<1x1x1xi32>
    %107 = vector.broadcast %106 : i32 to vector<16x128xi32>
    %108 = arith.cmpi eq, %102, %107 : vector<16x128xi32>
    %109 = vector.broadcast %c2048_i32_3 : i32 to vector<16x128xi32>
    %110 = arith.cmpi slt, %102, %109 : vector<16x128xi32>
    %111 = arith.andi %108, %110 : vector<16x128xi1>
    %112 = arith.ori %100, %111 : vector<16x128xi1>
    %113 = vector.broadcast %c2048_i32_3 : i32 to vector<16x128xi32>
    %114 = arith.select %111, %113, %102 : vector<16x128xi1>, vector<16x128xi32>
    %c9_i32 = arith.constant 9 : i32
    %115 = vector.shape_cast %114 : vector<16x128xi32> to vector<1x16x128xi32>
    %cst_13 = arith.constant dense<2147483647> : vector<1xi32>
    %116 = vector.multi_reduction <minsi>, %115, %cst_13 [1, 2] : vector<1x16x128xi32> to vector<1xi32>
    %117 = vector.shape_cast %116 : vector<1xi32> to vector<1x1x1xi32>
    %118 = vector.extract %117[0, 0, 0] : i32 from vector<1x1x1xi32>
    %119 = vector.broadcast %118 : i32 to vector<16x128xi32>
    %120 = arith.cmpi eq, %114, %119 : vector<16x128xi32>
    %121 = vector.broadcast %c2048_i32_3 : i32 to vector<16x128xi32>
    %122 = arith.cmpi slt, %114, %121 : vector<16x128xi32>
    %123 = arith.andi %120, %122 : vector<16x128xi1>
    %124 = arith.ori %112, %123 : vector<16x128xi1>
    %125 = vector.broadcast %c2048_i32_3 : i32 to vector<16x128xi32>
    %126 = arith.select %123, %125, %114 : vector<16x128xi1>, vector<16x128xi32>
    %c10_i32 = arith.constant 10 : i32
    %127 = vector.shape_cast %126 : vector<16x128xi32> to vector<1x16x128xi32>
    %cst_14 = arith.constant dense<2147483647> : vector<1xi32>
    %128 = vector.multi_reduction <minsi>, %127, %cst_14 [1, 2] : vector<1x16x128xi32> to vector<1xi32>
    %129 = vector.shape_cast %128 : vector<1xi32> to vector<1x1x1xi32>
    %130 = vector.extract %129[0, 0, 0] : i32 from vector<1x1x1xi32>
    %131 = vector.broadcast %130 : i32 to vector<16x128xi32>
    %132 = arith.cmpi eq, %126, %131 : vector<16x128xi32>
    %133 = vector.broadcast %c2048_i32_3 : i32 to vector<16x128xi32>
    %134 = arith.cmpi slt, %126, %133 : vector<16x128xi32>
    %135 = arith.andi %132, %134 : vector<16x128xi1>
    %136 = arith.ori %124, %135 : vector<16x128xi1>
    %137 = vector.broadcast %c2048_i32_3 : i32 to vector<16x128xi32>
    %138 = arith.select %135, %137, %126 : vector<16x128xi1>, vector<16x128xi32>
    %c11_i32 = arith.constant 11 : i32
    %139 = vector.shape_cast %138 : vector<16x128xi32> to vector<1x16x128xi32>
    %cst_15 = arith.constant dense<2147483647> : vector<1xi32>
    %140 = vector.multi_reduction <minsi>, %139, %cst_15 [1, 2] : vector<1x16x128xi32> to vector<1xi32>
    %141 = vector.shape_cast %140 : vector<1xi32> to vector<1x1x1xi32>
    %142 = vector.extract %141[0, 0, 0] : i32 from vector<1x1x1xi32>
    %143 = vector.broadcast %142 : i32 to vector<16x128xi32>
    %144 = arith.cmpi eq, %138, %143 : vector<16x128xi32>
    %145 = vector.broadcast %c2048_i32_3 : i32 to vector<16x128xi32>
    %146 = arith.cmpi slt, %138, %145 : vector<16x128xi32>
    %147 = arith.andi %144, %146 : vector<16x128xi1>
    %148 = arith.ori %136, %147 : vector<16x128xi1>
    %149 = vector.broadcast %c2048_i32_3 : i32 to vector<16x128xi32>
    %150 = arith.select %147, %149, %138 : vector<16x128xi1>, vector<16x128xi32>
    %c0_16 = arith.constant 0 : index
    %c0_17 = arith.constant 0 : index
    %151 = vector.load %arg2[%c0_16, %c0_17] : memref<16x128xf32, #tpu.memory_space<vmem>>, vector<16x128xf32>
    %cst_18 = arith.constant 1.000000e+00 : f32
    %152 = vector.broadcast %cst_18 : f32 to vector<16x128xf32>
    %153 = arith.select %148, %152, %151 : vector<16x128xi1>, vector<16x128xf32>
    %c0_19 = arith.constant 0 : index
    %c0_20 = arith.constant 0 : index
    %154 = vector.load %arg3[%c0_19, %c0_20] : memref<16x128xf32, #tpu.memory_space<vmem>>, vector<16x128xf32>
    tpu.vector_store %arg3[%c0_19, %c0_20], %153 {strides = array<i32>} : memref<16x128xf32, #tpu.memory_space<vmem>>, vector<16x128xf32>,
    return
  }
}

</mosaic_0001>

<bundles_post_ra>
// kernel: tpu_custom_call.1
= control target key start
LH: loop header
LB: loop body
LE: loop exit
PB: predicated region body
PF: predicated region fallthrough
CT: control target
= control target key end

     0   :  { %8 = vsyncpa [#allocation3], 0  ;;  %s816_s0 = inlined_call_operand.vmem [shape: s32[16,128], index: 0, kind: input, shape index: {}]   ;;  %s817_s1 = inlined_call_operand.vmem [shape: f32[16,128], index: 1, kind: input, shape index: {}]   ;;  %s818_s2 = inlined_call_operand.hbm [shape: f32[16,128], index: 2, kind: input, shape index: {}, may-alias: {2,3}]   ;;  %s819_s3 = inlined_call_operand.hbm [shape: f32[16,128], index: 3, kind: output, shape index: {}, may-alias: {2,3}]  }
   0x1   :  { %9 = vsyncpa [#allocation4], 0  ;;  %s572_s12 = smov [#allocation2]  }
   0x2   :  { %s19_s13 = sshll.u32 %s572_s12, 4  ;;  %s20_s13 = int_to_ptr.vmem [resolvable:$true] %s19_s13 }
   0x3   :  { %s536_s14 = scalar_lea.vmem %s20_s13, 256  ;;  %p541_p1 = scmp.lt.s32.totalorder %s20_s13, %s20_s13 }
   0x4   :  { %p537_p0 = scmp.ne.s32.totalorder %s20_s13, %s536_s14  ;;  %p542_p2 = scmp.lt.s32.totalorder %s536_s14, %s536_s14 }
   0x6   :  { %p543_p3 = por %p542_p2, %p541_p1 }
   0x8   :  { %p544_p4 = pnand %p543_p3, %p537_p0 }
   0xa   :  { %547 = shalt.err (!%p544_p4)
}
   0xb   :  { %s573_s15 = smov 128   ;;  %s574_s16 = smov 8  }
   0xc   :  { %25 = dma.hbm_to_vmem [thread:$0]  %s818_s2, 256, %s20_s13, [#allocation3], %s573_s15, %s573_s15, %s574_s16  }
   0xd   :  { %568 = dma.done.wait [#allocation3], 256  }
   0xe   :  { %569 = vsyncadd [#allocation3], 4294967040  ;;  %v29_v0 = vld [vmem:[%s817_s1] sm:$0xff]  ;;  %v30_v1 = vld [vmem:[%s817_s1 + $0x8] sm:$0xff]  ;;  %s575_s9 = smov [#allocation5]  }
   0xf   :  { %v33_v2 = vld [vmem:[%s816_s0] sm:$0xff]  ;;  %vm31_vm0 = vcmp.ne.f32.partialorder %v29_v0, 0.0  ;;  %vm32_vm1 = vcmp.ne.f32.partialorder %v30_v1, 0.0  ;;  %v34_v3 = vld [vmem:[%s816_s0 + $0x8] sm:$0xff]  ;;  %s488_s10 = sshll.u32 %s575_s9, 4  ;;  %s489_s10 = int_to_ptr.vmem [resolvable:$true] %s488_s10 }
  0x10   :  { %v35_v4 = vsel %vm31_vm0, %v33_v2, 2048  ;;  %v36_v5 = vsel %vm32_vm1, %v34_v3, 2048  ;;  %s548_s11 = scalar_lea.vmem %s489_s10, 256  ;;  %p553_p6 = scmp.lt.s32.totalorder %s489_s10, %s489_s10 }
  0x11   :  { %vm37_vm2 = vcmp.lt.s32.totalorder %v35_v4, %v36_v5  ;;  %vm66_vm7 = vcmp.lt.s32.totalorder %v35_v4, 2048  ;;  %vm67_vm8 = vcmp.lt.s32.totalorder %v36_v5, 2048  ;;  %p549_p5 = scmp.ne.s32.totalorder %s489_s10, %s548_s11  ;;  %p554_p7 = scmp.lt.s32.totalorder %s548_s11, %s548_s11 }
  0x12   :  { %v38_v6 = vsel %vm37_vm2, %v35_v4, %v36_v5 }
  0x13   :  { %v40_v7 = vshra.s32 %v38_v6, 16  ;;  %v39_v9 = vand.u32 65535, %v38_v6  ;;  %p555_p8 = por %p554_p7, %p553_p6 }
  0x15   :  { %v42_v8 = vcvt.s32.f32 %v40_v7  ;;  %v41_v10 = vcvt.s32.f32 %v39_v9  ;;  %p556_p9 = pnand %p555_p8, %p549_p5 }
  0x17   :  { %43 = vmin.xlane.f32.xlu0 %v42_v8 }
  0xa0   :  { %v44_v11 = vpop.xlane.xlu0 %43 }
  0xa1   :  { %vm45_vm3 = vcmp.eq.f32.partialorder %v42_v8, %v44_v11  ;;  %v50_v13 = vcvt.f32.s32 %v44_v11 }
  0xa2   :  { %v46_v12 = vsel %vm45_vm3, %v41_v10, inf }
  0xa3   :  { %47 = vmin.xlane.f32.xlu0 %v46_v12  ;;  %v51_v15 = vshll.u32 %v50_v13, 16 }
 0x12c   :  { %v48_v14 = vpop.xlane.xlu0 %47 }
 0x12d   :  { %v49_v16 = vcvt.f32.s32 %v48_v14 }
 0x12f   :  { %v52_v17 = vadd.s32 %v51_v15, %v49_v16 }
 0x131   :  { %v53_v18 = vrot.slane %v52_v17, 4 }
 0x133   :  { %vm54_vm4 = vcmp.lt.s32.totalorder %v52_v17, %v53_v18 }
 0x134   :  { %v55_v19 = vsel %vm54_vm4, %v52_v17, %v53_v18 }
 0x135   :  { %v56_v20 = vrot.slane %v55_v19, 2 }
 0x137   :  { %vm57_vm5 = vcmp.lt.s32.totalorder %v55_v19, %v56_v20 }
 0x138   :  { %v58_v21 = vsel %vm57_vm5, %v55_v19, %v56_v20 }
 0x139   :  { %v59_v22 = vrot.slane %v58_v21, 1 }
 0x13b   :  { %vm60_vm6 = vcmp.lt.s32.totalorder %v58_v21, %v59_v22 }
 0x13c   :  { %v61_v23 = vsel %vm60_vm6, %v58_v21, %v59_v22 }
 0x13d   :  { %500 = vpush %v61_v23 }
 0x16e   :  { %s501_s0 = spop %500 }
 0x16f   :  { %v63_v24 = vstv %s501_s0 }
 0x170   :  { %vm64_vm9 = vcmp.eq.s32.totalorder %v35_v4, %v63_v24  ;;  %vm65_vm10 = vcmp.eq.s32.totalorder %v36_v5, %v63_v24 }
 0x171   :  { %vm614_vm11 = vmand %vm64_vm9, %vm66_vm7 }
 0x172   :  { %vm618_vm12 = vmand %vm65_vm10, %vm67_vm8  ;;  %v70_v27 = vsel %vm614_vm11, 2048, %v35_v4 }
 0x173   :  { %v71_v28 = vsel %vm618_vm12, 2048, %v36_v5  ;;  %vm101_vm4 = vcmp.lt.s32.totalorder %v70_v27, 2048 }
 0x174   :  { %vm72_vm13 = vcmp.lt.s32.totalorder %v70_v27, %v71_v28  ;;  %vm102_vm5 = vcmp.lt.s32.totalorder %v71_v28, 2048 }
 0x175   :  { %v73_v29 = vsel %vm72_vm13, %v70_v27, %v71_v28 }
 0x176   :  { %v75_v30 = vshra.s32 %v73_v29, 16  ;;  %v74_v32 = vand.u32 65535, %v73_v29 }
 0x178   :  { %v77_v31 = vcvt.s32.f32 %v75_v30  ;;  %v76_v34 = vcvt.s32.f32 %v74_v32 }
 0x17a   :  { %78 = vmin.xlane.f32.xlu1 %v77_v31 }
 0x203   :  { %v79_v33 = vpop.xlane.xlu1 %78 }
 0x204   :  { %vm80_vm14 = vcmp.eq.f32.partialorder %v77_v31, %v79_v33  ;;  %v85_v36 = vcvt.f32.s32 %v79_v33 }
 0x205   :  { %v81_v35 = vsel %vm80_vm14, %v76_v34, inf }
 0x206   :  { %82 = vmin.xlane.f32.xlu1 %v81_v35  ;;  %v86_v38 = vshll.u32 %v85_v36, 16 }
 0x28f   :  { %v83_v37 = vpop.xlane.xlu1 %82 }
 0x290   :  { %v84_v39 = vcvt.f32.s32 %v83_v37 }
 0x292   :  { %v87_v40 = vadd.s32 %v86_v38, %v84_v39 }
 0x294   :  { %v88_v41 = vrot.slane %v87_v40, 4 }
 0x296   :  { %vm89_vm15 = vcmp.lt.s32.totalorder %v87_v40, %v88_v41 }
 0x297   :  { %v90_v42 = vsel %vm89_vm15, %v87_v40, %v88_v41 }
 0x298   :  { %v91_v43 = vrot.slane %v90_v42, 2 }
 0x29a   :  { %vm92_vm0 = vcmp.lt.s32.totalorder %v90_v42, %v91_v43 }
 0x29b   :  { %v93_v44 = vsel %vm92_vm0, %v90_v42, %v91_v43 }
 0x29c   :  { %v94_v45 = vrot.slane %v93_v44, 1 }
 0x29e   :  { %vm95_vm1 = vcmp.lt.s32.totalorder %v93_v44, %v94_v45 }
 0x29f   :  { %v96_v46 = vsel %vm95_vm1, %v93_v44, %v94_v45 }
 0x2a0   :  { %502 = vpush %v96_v46 }
 0x2d1   :  { %s503_s1 = spop %502 }
 0x2d2   :  { %v98_v47 = vstv %s503_s1 }
 0x2d3   :  { %vm99_vm2 = vcmp.eq.s32.totalorder %v70_v27, %v98_v47  ;;  %vm100_vm3 = vcmp.eq.s32.totalorder %v71_v28, %v98_v47 }
 0x2d4   :  { %vm626_vm6 = vmand %vm99_vm2, %vm101_vm4 }
 0x2d5   :  { %vm630_vm7 = vmand %vm100_vm3, %vm102_vm5  ;;  %v107_v50 = vsel %vm626_vm6, 2048, %v70_v27 }
 0x2d6   :  { %v108_v51 = vsel %vm630_vm7, 2048, %v71_v28  ;;  %vm105_vm15 = vmor %vm614_vm11, %vm626_vm6  ;;  %vm138_vm3 = vcmp.lt.s32.totalorder %v107_v50, 2048 }
 0x2d7   :  { %vm109_vm8 = vcmp.lt.s32.totalorder %v107_v50, %v108_v51  ;;  %vm106_vm0 = vmor %vm618_vm12, %vm630_vm7  ;;  %vm139_vm4 = vcmp.lt.s32.totalorder %v108_v51, 2048 }
 0x2d8   :  { %v110_v52 = vsel %vm109_vm8, %v107_v50, %v108_v51 }
 0x2d9   :  { %v112_v53 = vshra.s32 %v110_v52, 16  ;;  %v111_v55 = vand.u32 65535, %v110_v52 }
 0x2db   :  { %v114_v54 = vcvt.s32.f32 %v112_v53  ;;  %v113_v57 = vcvt.s32.f32 %v111_v55 }
 0x2dd   :  { %115 = vmin.xlane.f32.xlu0 %v114_v54 }
 0x366   :  { %v116_v56 = vpop.xlane.xlu0 %115 }
 0x367   :  { %vm117_vm9 = vcmp.eq.f32.partialorder %v114_v54, %v116_v56  ;;  %v122_v59 = vcvt.f32.s32 %v116_v56 }
 0x368   :  { %v118_v58 = vsel %vm117_vm9, %v113_v57, inf }
 0x369   :  { %119 = vmin.xlane.f32.xlu1 %v118_v58  ;;  %v123_v61 = vshll.u32 %v122_v59, 16 }
 0x3f2   :  { %v120_v60 = vpop.xlane.xlu1 %119 }
 0x3f3   :  { %v121_v62 = vcvt.f32.s32 %v120_v60 }
 0x3f5   :  { %v124_v63 = vadd.s32 %v123_v61, %v121_v62 }
 0x3f7   :  { %v125_v0 = vrot.slane %v124_v63, 4 }
 0x3f9   :  { %vm126_vm10 = vcmp.lt.s32.totalorder %v124_v63, %v125_v0 }
 0x3fa   :  { %v127_v1 = vsel %vm126_vm10, %v124_v63, %v125_v0 }
 0x3fb   :  { %v128_v2 = vrot.slane %v127_v1, 2 }
 0x3fd   :  { %vm129_vm13 = vcmp.lt.s32.totalorder %v127_v1, %v128_v2 }
 0x3fe   :  { %v130_v3 = vsel %vm129_vm13, %v127_v1, %v128_v2 }
 0x3ff   :  { %v131_v4 = vrot.slane %v130_v3, 1 }
 0x401   :  { %vm132_vm14 = vcmp.lt.s32.totalorder %v130_v3, %v131_v4 }
 0x402   :  { %v133_v5 = vsel %vm132_vm14, %v130_v3, %v131_v4 }
 0x403   :  { %504 = vpush %v133_v5 }
 0x434   :  { %s505_s2 = spop %504 }
 0x435   :  { %v135_v6 = vstv %s505_s2 }
 0x436   :  { %vm136_vm1 = vcmp.eq.s32.totalorder %v107_v50, %v135_v6  ;;  %vm137_vm2 = vcmp.eq.s32.totalorder %v108_v51, %v135_v6 }
 0x437   :  { %vm140_vm5 = vmand %vm136_vm1, %vm138_vm3 }
 0x438   :  { %vm141_vm8 = vmand %vm137_vm2, %vm139_vm4  ;;  %v144_v7 = vsel %vm140_vm5, 2048, %v107_v50 }
 0x439   :  { %vm646_vm9 = vmor %vm105_vm15, %vm140_vm5  ;;  %v145_v9 = vsel %vm141_vm8, 2048, %v108_v51 }
 0x43a   :  { %vm650_vm10 = vmor %vm106_vm0, %vm141_vm8  ;;  %vm146_vm11 = vcmp.lt.s32.totalorder %v144_v7, %v145_v9  ;;  %vm175_vm0 = vcmp.lt.s32.totalorder %v144_v7, 2048  ;;  %vm176_vm1 = vcmp.lt.s32.totalorder %v145_v9, 2048 }
 0x43b   :  { %v147_v11 = vsel %vm146_vm11, %v144_v7, %v145_v9 }
 0x43c   :  { %v149_v12 = vshra.s32 %v147_v11, 16  ;;  %v148_v14 = vand.u32 65535, %v147_v11 }
 0x43e   :  { %v151_v13 = vcvt.s32.f32 %v149_v12  ;;  %v150_v16 = vcvt.s32.f32 %v148_v14 }
 0x440   :  { %152 = vmin.xlane.f32.xlu0 %v151_v13 }
 0x4c9   :  { %v153_v15 = vpop.xlane.xlu0 %152 }
 0x4ca   :  { %vm154_vm12 = vcmp.eq.f32.partialorder %v151_v13, %v153_v15  ;;  %v159_v18 = vcvt.f32.s32 %v153_v15 }
 0x4cb   :  { %v155_v17 = vsel %vm154_vm12, %v150_v16, inf }
 0x4cc   :  { %156 = vmin.xlane.f32.xlu1 %v155_v17  ;;  %v160_v20 = vshll.u32 %v159_v18, 16 }
 0x555   :  { %v157_v19 = vpop.xlane.xlu1 %156 }
 0x556   :  { %v158_v21 = vcvt.f32.s32 %v157_v19 }
 0x558   :  { %v161_v22 = vadd.s32 %v160_v20, %v158_v21 }
 0x55a   :  { %v162_v23 = vrot.slane %v161_v22, 4 }
 0x55c   :  { %vm163_vm6 = vcmp.lt.s32.totalorder %v161_v22, %v162_v23 }
 0x55d   :  { %v164_v24 = vsel %vm163_vm6, %v161_v22, %v162_v23 }
 0x55e   :  { %v165_v25 = vrot.slane %v164_v24, 2 }
 0x560   :  { %vm166_vm7 = vcmp.lt.s32.totalorder %v164_v24, %v165_v25 }
 0x561   :  { %v167_v26 = vsel %vm166_vm7, %v164_v24, %v165_v25 }
 0x562   :  { %v168_v27 = vrot.slane %v167_v26, 1 }
 0x564   :  { %vm169_vm13 = vcmp.lt.s32.totalorder %v167_v26, %v168_v27 }
 0x565   :  { %v170_v28 = vsel %vm169_vm13, %v167_v26, %v168_v27 }
 0x566   :  { %506 = vpush %v170_v28 }
 0x597   :  { %s507_s27 = spop %506 }
 0x598   :  { %v172_v29 = vstv %s507_s27 }
 0x599   :  { %vm173_vm14 = vcmp.eq.s32.totalorder %v144_v7, %v172_v29  ;;  %vm174_vm15 = vcmp.eq.s32.totalorder %v145_v9, %v172_v29 }
 0x59a   :  { %vm654_vm2 = vmand %vm173_vm14, %vm175_vm0 }
 0x59b   :  { %vm658_vm3 = vmand %vm174_vm15, %vm176_vm1  ;;  %v181_v32 = vsel %vm654_vm2, 2048, %v144_v7 }
 0x59c   :  { %vm179_vm4 = vmor %vm646_vm9, %vm654_vm2  ;;  %v182_v33 = vsel %vm658_vm3, 2048, %v145_v9  ;;  %vm212_vm15 = vcmp.lt.s32.totalorder %v181_v32, 2048 }
 0x59d   :  { %vm180_vm5 = vmor %vm650_vm10, %vm658_vm3  ;;  %vm183_vm8 = vcmp.lt.s32.totalorder %v181_v32, %v182_v33  ;;  %vm213_vm0 = vcmp.lt.s32.totalorder %v182_v33, 2048 }
 0x59e   :  { %v184_v34 = vsel %vm183_vm8, %v181_v32, %v182_v33 }
 0x59f   :  { %v186_v35 = vshra.s32 %v184_v34, 16  ;;  %v185_v37 = vand.u32 65535, %v184_v34 }
 0x5a1   :  { %v188_v36 = vcvt.s32.f32 %v186_v35  ;;  %v187_v39 = vcvt.s32.f32 %v185_v37 }
 0x5a3   :  { %189 = vmin.xlane.f32.xlu0 %v188_v36 }
 0x62c   :  { %v190_v38 = vpop.xlane.xlu0 %189 }
 0x62d   :  { %vm191_vm11 = vcmp.eq.f32.partialorder %v188_v36, %v190_v38  ;;  %v196_v41 = vcvt.f32.s32 %v190_v38 }
 0x62e   :  { %v192_v40 = vsel %vm191_vm11, %v187_v39, inf }
 0x62f   :  { %193 = vmin.xlane.f32.xlu1 %v192_v40  ;;  %v197_v43 = vshll.u32 %v196_v41, 16 }
 0x6b8   :  { %v194_v42 = vpop.xlane.xlu1 %193 }
 0x6b9   :  { %v195_v44 = vcvt.f32.s32 %v194_v42 }
 0x6bb   :  { %v198_v45 = vadd.s32 %v197_v43, %v195_v44 }
 0x6bd   :  { %v199_v46 = vrot.slane %v198_v45, 4 }
 0x6bf   :  { %vm200_vm12 = vcmp.lt.s32.totalorder %v198_v45, %v199_v46 }
 0x6c0   :  { %v201_v47 = vsel %vm200_vm12, %v198_v45, %v199_v46 }
 0x6c1   :  { %v202_v48 = vrot.slane %v201_v47, 2 }
 0x6c3   :  { %vm203_vm6 = vcmp.lt.s32.totalorder %v201_v47, %v202_v48 }
 0x6c4   :  { %v204_v49 = vsel %vm203_vm6, %v201_v47, %v202_v48 }
 0x6c5   :  { %v205_v50 = vrot.slane %v204_v49, 1 }
 0x6c7   :  { %vm206_vm7 = vcmp.lt.s32.totalorder %v204_v49, %v205_v50 }
 0x6c8   :  { %v207_v51 = vsel %vm206_vm7, %v204_v49, %v205_v50 }
 0x6c9   :  { %508 = vpush %v207_v51 }
 0x6fa   :  { %s509_s28 = spop %508 }
 0x6fb   :  { %v209_v52 = vstv %s509_s28 }
 0x6fc   :  { %vm210_vm13 = vcmp.eq.s32.totalorder %v181_v32, %v209_v52  ;;  %vm211_vm14 = vcmp.eq.s32.totalorder %v182_v33, %v209_v52 }
 0x6fd   :  { %vm214_vm1 = vmand %vm210_vm13, %vm212_vm15 }
 0x6fe   :  { %vm215_vm8 = vmand %vm211_vm14, %vm213_vm0  ;;  %v218_v53 = vsel %vm214_vm1, 2048, %v181_v32 }
 0x6ff   :  { %vm679_vm11 = vmor %vm179_vm4, %vm214_vm1  ;;  %v219_v55 = vsel %vm215_vm8, 2048, %v182_v33  ;;  %vm249_vm7 = vcmp.lt.s32.totalorder %v218_v53, 2048 }
 0x700   :  { %vm688_vm12 = vmor %vm180_vm5, %vm215_vm8  ;;  %vm220_vm6 = vcmp.lt.s32.totalorder %v218_v53, %v219_v55  ;;  %vm250_vm13 = vcmp.lt.s32.totalorder %v219_v55, 2048 }
 0x701   :  { %v221_v57 = vsel %vm220_vm6, %v218_v53, %v219_v55 }
 0x702   :  { %v223_v58 = vshra.s32 %v221_v57, 16  ;;  %v222_v60 = vand.u32 65535, %v221_v57 }
 0x704   :  { %v225_v59 = vcvt.s32.f32 %v223_v58  ;;  %v224_v62 = vcvt.s32.f32 %v222_v60 }
 0x706   :  { %226 = vmin.xlane.f32.xlu0 %v225_v59 }
 0x78f   :  { %v227_v61 = vpop.xlane.xlu0 %226 }
 0x790   :  { %vm228_vm9 = vcmp.eq.f32.partialorder %v225_v59, %v227_v61  ;;  %v233_v0 = vcvt.f32.s32 %v227_v61 }
 0x791   :  { %v229_v63 = vsel %vm228_vm9, %v224_v62, inf }
 0x792   :  { %230 = vmin.xlane.f32.xlu1 %v229_v63  ;;  %v234_v2 = vshll.u32 %v233_v0, 16 }
 0x81b   :  { %v231_v1 = vpop.xlane.xlu1 %230 }
 0x81c   :  { %v232_v3 = vcvt.f32.s32 %v231_v1 }
 0x81e   :  { %v235_v4 = vadd.s32 %v234_v2, %v232_v3 }
 0x820   :  { %v236_v5 = vrot.slane %v235_v4, 4 }
 0x822   :  { %vm237_vm10 = vcmp.lt.s32.totalorder %v235_v4, %v236_v5 }
 0x823   :  { %v238_v6 = vsel %vm237_vm10, %v235_v4, %v236_v5 }
 0x824   :  { %v239_v7 = vrot.slane %v238_v6, 2 }
 0x826   :  { %vm240_vm2 = vcmp.lt.s32.totalorder %v238_v6, %v239_v7 }
 0x827   :  { %v241_v8 = vsel %vm240_vm2, %v238_v6, %v239_v7 }
 0x828   :  { %v242_v9 = vrot.slane %v241_v8, 1 }
 0x82a   :  { %vm243_vm3 = vcmp.lt.s32.totalorder %v241_v8, %v242_v9 }
 0x82b   :  { %v244_v10 = vsel %vm243_vm3, %v241_v8, %v242_v9 }
 0x82c   :  { %510 = vpush %v244_v10 }
 0x85d   :  { %s511_s29 = spop %510 }
 0x85e   :  { %v246_v11 = vstv %s511_s29 }
 0x85f   :  { %vm247_vm4 = vcmp.eq.s32.totalorder %v218_v53, %v246_v11  ;;  %vm248_vm5 = vcmp.eq.s32.totalorder %v219_v55, %v246_v11 }
 0x860   :  { %vm692_vm14 = vmand %vm247_vm4, %vm249_vm7 }
 0x861   :  { %vm696_vm15 = vmand %vm248_vm5, %vm250_vm13  ;;  %v255_v14 = vsel %vm692_vm14, 2048, %v218_v53 }
 0x862   :  { %vm253_vm0 = vmor %vm679_vm11, %vm692_vm14  ;;  %v256_v15 = vsel %vm696_vm15, 2048, %v219_v55  ;;  %vm286_vm5 = vcmp.lt.s32.totalorder %v255_v14, 2048 }
 0x863   :  { %vm254_vm1 = vmor %vm688_vm12, %vm696_vm15  ;;  %vm257_vm8 = vcmp.lt.s32.totalorder %v255_v14, %v256_v15  ;;  %vm287_vm7 = vcmp.lt.s32.totalorder %v256_v15, 2048 }
 0x864   :  { %v258_v16 = vsel %vm257_vm8, %v255_v14, %v256_v15 }
 0x865   :  { %v260_v17 = vshra.s32 %v258_v16, 16  ;;  %v259_v19 = vand.u32 65535, %v258_v16 }
 0x867   :  { %v262_v18 = vcvt.s32.f32 %v260_v17  ;;  %v261_v21 = vcvt.s32.f32 %v259_v19 }
 0x869   :  { %263 = vmin.xlane.f32.xlu0 %v262_v18 }
 0x8f2   :  { %v264_v20 = vpop.xlane.xlu0 %263 }
 0x8f3   :  { %vm265_vm6 = vcmp.eq.f32.partialorder %v262_v18, %v264_v20  ;;  %v270_v23 = vcvt.f32.s32 %v264_v20 }
 0x8f4   :  { %v266_v22 = vsel %vm265_vm6, %v261_v21, inf }
 0x8f5   :  { %267 = vmin.xlane.f32.xlu1 %v266_v22  ;;  %v271_v25 = vshll.u32 %v270_v23, 16 }
 0x97e   :  { %v268_v24 = vpop.xlane.xlu1 %267 }
 0x97f   :  { %v269_v26 = vcvt.f32.s32 %v268_v24 }
 0x981   :  { %v272_v27 = vadd.s32 %v271_v25, %v269_v26 }
 0x983   :  { %v273_v28 = vrot.slane %v272_v27, 4 }
 0x985   :  { %vm274_vm9 = vcmp.lt.s32.totalorder %v272_v27, %v273_v28 }
 0x986   :  { %v275_v29 = vsel %vm274_vm9, %v272_v27, %v273_v28 }
 0x987   :  { %v276_v30 = vrot.slane %v275_v29, 2 }
 0x989   :  { %vm277_vm10 = vcmp.lt.s32.totalorder %v275_v29, %v276_v30 }
 0x98a   :  { %v278_v31 = vsel %vm277_vm10, %v275_v29, %v276_v30 }
 0x98b   :  { %v279_v32 = vrot.slane %v278_v31, 1 }
 0x98d   :  { %vm280_vm2 = vcmp.lt.s32.totalorder %v278_v31, %v279_v32 }
 0x98e   :  { %v281_v33 = vsel %vm280_vm2, %v278_v31, %v279_v32 }
 0x98f   :  { %512 = vpush %v281_v33 }
 0x9c0   :  { %s513_s30 = spop %512 }
 0x9c1   :  { %v283_v34 = vstv %s513_s30 }
 0x9c2   :  { %vm284_vm3 = vcmp.eq.s32.totalorder %v255_v14, %v283_v34  ;;  %vm285_vm4 = vcmp.eq.s32.totalorder %v256_v15, %v283_v34 }
 0x9c3   :  { %vm288_vm13 = vmand %vm284_vm3, %vm286_vm5 }
 0x9c4   :  { %vm289_vm8 = vmand %vm285_vm4, %vm287_vm7  ;;  %v292_v35 = vsel %vm288_vm13, 2048, %v255_v14 }
 0x9c5   :  { %vm717_vm6 = vmor %vm253_vm0, %vm288_vm13  ;;  %v293_v37 = vsel %vm289_vm8, 2048, %v256_v15  ;;  %vm323_vm2 = vcmp.lt.s32.totalorder %v292_v35, 2048 }
 0x9c6   :  { %vm726_vm9 = vmor %vm254_vm1, %vm289_vm8  ;;  %vm294_vm10 = vcmp.lt.s32.totalorder %v292_v35, %v293_v37  ;;  %vm324_vm3 = vcmp.lt.s32.totalorder %v293_v37, 2048 }
 0x9c7   :  { %v295_v39 = vsel %vm294_vm10, %v292_v35, %v293_v37 }
 0x9c8   :  { %v297_v40 = vshra.s32 %v295_v39, 16  ;;  %v296_v42 = vand.u32 65535, %v295_v39 }
 0x9ca   :  { %v299_v41 = vcvt.s32.f32 %v297_v40  ;;  %v298_v44 = vcvt.s32.f32 %v296_v42 }
 0x9cc   :  { %300 = vmin.xlane.f32.xlu0 %v299_v41 }
 0xa55   :  { %v301_v43 = vpop.xlane.xlu0 %300 }
 0xa56   :  { %vm302_vm11 = vcmp.eq.f32.partialorder %v299_v41, %v301_v43  ;;  %v307_v46 = vcvt.f32.s32 %v301_v43 }
 0xa57   :  { %v303_v45 = vsel %vm302_vm11, %v298_v44, inf }
 0xa58   :  { %304 = vmin.xlane.f32.xlu1 %v303_v45  ;;  %v308_v48 = vshll.u32 %v307_v46, 16 }
 0xae1   :  { %v305_v47 = vpop.xlane.xlu1 %304 }
 0xae2   :  { %v306_v49 = vcvt.f32.s32 %v305_v47 }
 0xae4   :  { %v309_v50 = vadd.s32 %v308_v48, %v306_v49 }
 0xae6   :  { %v310_v51 = vrot.slane %v309_v50, 4 }
 0xae8   :  { %vm311_vm12 = vcmp.lt.s32.totalorder %v309_v50, %v310_v51 }
 0xae9   :  { %v312_v52 = vsel %vm311_vm12, %v309_v50, %v310_v51 }
 0xaea   :  { %v313_v53 = vrot.slane %v312_v52, 2 }
 0xaec   :  { %vm314_vm14 = vcmp.lt.s32.totalorder %v312_v52, %v313_v53 }
 0xaed   :  { %v315_v54 = vsel %vm314_vm14, %v312_v52, %v313_v53 }
 0xaee   :  { %v316_v55 = vrot.slane %v315_v54, 1 }
 0xaf0   :  { %vm317_vm15 = vcmp.lt.s32.totalorder %v315_v54, %v316_v55 }
 0xaf1   :  { %v318_v56 = vsel %vm317_vm15, %v315_v54, %v316_v55 }
 0xaf2   :  { %514 = vpush %v318_v56 }
 0xb23   :  { %s515_s4 = spop %514 }
 0xb24   :  { %v320_v57 = vstv %s515_s4 }
 0xb25   :  { %vm321_vm0 = vcmp.eq.s32.totalorder %v292_v35, %v320_v57  ;;  %vm322_vm1 = vcmp.eq.s32.totalorder %v293_v37, %v320_v57 }
 0xb26   :  { %vm730_vm4 = vmand %vm321_vm0, %vm323_vm2 }
 0xb27   :  { %vm734_vm5 = vmand %vm322_vm1, %vm324_vm3  ;;  %v329_v60 = vsel %vm730_vm4, 2048, %v292_v35 }
 0xb28   :  { %vm327_vm7 = vmor %vm717_vm6, %vm730_vm4  ;;  %v330_v61 = vsel %vm734_vm5, 2048, %v293_v37  ;;  %vm360_vm1 = vcmp.lt.s32.totalorder %v329_v60, 2048 }
 0xb29   :  { %vm328_vm13 = vmor %vm726_vm9, %vm734_vm5  ;;  %vm331_vm8 = vcmp.lt.s32.totalorder %v329_v60, %v330_v61  ;;  %vm361_vm2 = vcmp.lt.s32.totalorder %v330_v61, 2048 }
 0xb2a   :  { %v332_v62 = vsel %vm331_vm8, %v329_v60, %v330_v61 }
 0xb2b   :  { %v334_v63 = vshra.s32 %v332_v62, 16  ;;  %v333_v1 = vand.u32 65535, %v332_v62 }
 0xb2d   :  { %v336_v0 = vcvt.s32.f32 %v334_v63  ;;  %v335_v3 = vcvt.s32.f32 %v333_v1 }
 0xb2f   :  { %337 = vmin.xlane.f32.xlu0 %v336_v0 }
 0xbb8   :  { %v338_v2 = vpop.xlane.xlu0 %337 }
 0xbb9   :  { %vm339_vm10 = vcmp.eq.f32.partialorder %v336_v0, %v338_v2  ;;  %v344_v5 = vcvt.f32.s32 %v338_v2 }
 0xbba   :  { %v340_v4 = vsel %vm339_vm10, %v335_v3, inf }
 0xbbb   :  { %341 = vmin.xlane.f32.xlu1 %v340_v4  ;;  %v345_v7 = vshll.u32 %v344_v5, 16 }
 0xc44   :  { %v342_v6 = vpop.xlane.xlu1 %341 }
 0xc45   :  { %v343_v8 = vcvt.f32.s32 %v342_v6 }
 0xc47   :  { %v346_v9 = vadd.s32 %v345_v7, %v343_v8 }
 0xc49   :  { %v347_v10 = vrot.slane %v346_v9, 4 }
 0xc4b   :  { %vm348_vm11 = vcmp.lt.s32.totalorder %v346_v9, %v347_v10 }
 0xc4c   :  { %v349_v11 = vsel %vm348_vm11, %v346_v9, %v347_v10 }
 0xc4d   :  { %v350_v12 = vrot.slane %v349_v11, 2 }
 0xc4f   :  { %vm351_vm12 = vcmp.lt.s32.totalorder %v349_v11, %v350_v12 }
 0xc50   :  { %v352_v13 = vsel %vm351_vm12, %v349_v11, %v350_v12 }
 0xc51   :  { %v353_v14 = vrot.slane %v352_v13, 1 }
 0xc53   :  { %vm354_vm14 = vcmp.lt.s32.totalorder %v352_v13, %v353_v14 }
 0xc54   :  { %v355_v15 = vsel %vm354_vm14, %v352_v13, %v353_v14 }
 0xc55   :  { %516 = vpush %v355_v15 }
 0xc86   :  { %s517_s5 = spop %516 }
 0xc87   :  { %v357_v16 = vstv %s517_s5 }
 0xc88   :  { %vm358_vm15 = vcmp.eq.s32.totalorder %v329_v60, %v357_v16  ;;  %vm359_vm0 = vcmp.eq.s32.totalorder %v330_v61, %v357_v16 }
 0xc89   :  { %vm362_vm3 = vmand %vm358_vm15, %vm360_vm1 }
 0xc8a   :  { %vm363_vm8 = vmand %vm359_vm0, %vm361_vm2  ;;  %v366_v17 = vsel %vm362_vm3, 2048, %v329_v60 }
 0xc8b   :  { %vm755_vm10 = vmor %vm327_vm7, %vm362_vm3  ;;  %v367_v19 = vsel %vm363_vm8, 2048, %v330_v61  ;;  %vm397_vm14 = vcmp.lt.s32.totalorder %v366_v17, 2048 }
 0xc8c   :  { %vm764_vm11 = vmor %vm328_vm13, %vm363_vm8  ;;  %vm368_vm12 = vcmp.lt.s32.totalorder %v366_v17, %v367_v19  ;;  %vm398_vm15 = vcmp.lt.s32.totalorder %v367_v19, 2048 }
 0xc8d   :  { %v369_v21 = vsel %vm368_vm12, %v366_v17, %v367_v19 }
 0xc8e   :  { %v371_v22 = vshra.s32 %v369_v21, 16  ;;  %v370_v24 = vand.u32 65535, %v369_v21 }
 0xc90   :  { %v373_v23 = vcvt.s32.f32 %v371_v22  ;;  %v372_v26 = vcvt.s32.f32 %v370_v24  ;;  %v477_v22 = vld [vmem:[#allocation2] sm:$0xff] }
 0xc92   :  { %374 = vmin.xlane.f32.xlu0 %v373_v23 }
 0xd1b   :  { %v375_v25 = vpop.xlane.xlu0 %374 }
 0xd1c   :  { %vm376_vm6 = vcmp.eq.f32.partialorder %v373_v23, %v375_v25  ;;  %v381_v28 = vcvt.f32.s32 %v375_v25  ;;  %v478_v23 = vld [vmem:[#allocation2 + $0x8] sm:$0xff] }
 0xd1d   :  { %v377_v27 = vsel %vm376_vm6, %v372_v26, inf }
 0xd1e   :  { %378 = vmin.xlane.f32.xlu1 %v377_v27  ;;  %v382_v30 = vshll.u32 %v381_v28, 16 }
 0xda7   :  { %v379_v29 = vpop.xlane.xlu1 %378 }
 0xda8   :  { %v380_v31 = vcvt.f32.s32 %v379_v29 }
 0xdaa   :  { %v383_v32 = vadd.s32 %v382_v30, %v380_v31 }
 0xdac   :  { %v384_v33 = vrot.slane %v383_v32, 4 }
 0xdae   :  { %vm385_vm9 = vcmp.lt.s32.totalorder %v383_v32, %v384_v33 }
 0xdaf   :  { %v386_v34 = vsel %vm385_vm9, %v383_v32, %v384_v33 }
 0xdb0   :  { %v387_v35 = vrot.slane %v386_v34, 2 }
 0xdb2   :  { %vm388_vm4 = vcmp.lt.s32.totalorder %v386_v34, %v387_v35 }
 0xdb3   :  { %v389_v36 = vsel %vm388_vm4, %v386_v34, %v387_v35 }
 0xdb4   :  { %v390_v37 = vrot.slane %v389_v36, 1 }
 0xdb6   :  { %vm391_vm5 = vcmp.lt.s32.totalorder %v389_v36, %v390_v37 }
 0xdb7   :  { %v392_v38 = vsel %vm391_vm5, %v389_v36, %v390_v37 }
 0xdb8   :  { %518 = vpush %v392_v38 }
 0xde9   :  { %s519_s6 = spop %518 }
 0xdea   :  { %v394_v39 = vstv %s519_s6 }
 0xdeb   :  { %vm395_vm7 = vcmp.eq.s32.totalorder %v366_v17, %v394_v39  ;;  %vm396_vm13 = vcmp.eq.s32.totalorder %v367_v19, %v394_v39 }
 0xdec   :  { %vm768_vm0 = vmand %vm395_vm7, %vm397_vm14 }
 0xded   :  { %vm772_vm1 = vmand %vm396_vm13, %vm398_vm15  ;;  %v403_v42 = vsel %vm768_vm0, 2048, %v366_v17 }
 0xdee   :  { %vm401_vm2 = vmor %vm755_vm10, %vm768_vm0  ;;  %v404_v43 = vsel %vm772_vm1, 2048, %v367_v19  ;;  %vm434_vm13 = vcmp.lt.s32.totalorder %v403_v42, 2048 }
 0xdef   :  { %vm402_vm3 = vmor %vm764_vm11, %vm772_vm1  ;;  %vm405_vm8 = vcmp.lt.s32.totalorder %v403_v42, %v404_v43  ;;  %vm435_vm14 = vcmp.lt.s32.totalorder %v404_v43, 2048 }
 0xdf0   :  { %v406_v44 = vsel %vm405_vm8, %v403_v42, %v404_v43 }
 0xdf1   :  { %v408_v45 = vshra.s32 %v406_v44, 16  ;;  %v407_v47 = vand.u32 65535, %v406_v44 }
 0xdf3   :  { %v410_v46 = vcvt.s32.f32 %v408_v45  ;;  %v409_v49 = vcvt.s32.f32 %v407_v47 }
 0xdf5   :  { %411 = vmin.xlane.f32.xlu0 %v410_v46 }
 0xe7e   :  { %v412_v48 = vpop.xlane.xlu0 %411 }
 0xe7f   :  { %vm413_vm12 = vcmp.eq.f32.partialorder %v410_v46, %v412_v48  ;;  %v418_v51 = vcvt.f32.s32 %v412_v48 }
 0xe80   :  { %v414_v50 = vsel %vm413_vm12, %v409_v49, inf }
 0xe81   :  { %415 = vmin.xlane.f32.xlu1 %v414_v50  ;;  %v419_v53 = vshll.u32 %v418_v51, 16 }
 0xf0a   :  { %v416_v52 = vpop.xlane.xlu1 %415 }
 0xf0b   :  { %v417_v54 = vcvt.f32.s32 %v416_v52 }
 0xf0d   :  { %v420_v55 = vadd.s32 %v419_v53, %v417_v54 }
 0xf0f   :  { %v421_v56 = vrot.slane %v420_v55, 4 }
 0xf11   :  { %vm422_vm6 = vcmp.lt.s32.totalorder %v420_v55, %v421_v56 }
 0xf12   :  { %v423_v57 = vsel %vm422_vm6, %v420_v55, %v421_v56 }
 0xf13   :  { %v424_v58 = vrot.slane %v423_v57, 2 }
 0xf15   :  { %vm425_vm9 = vcmp.lt.s32.totalorder %v423_v57, %v424_v58 }
 0xf16   :  { %v426_v59 = vsel %vm425_vm9, %v423_v57, %v424_v58 }
 0xf17   :  { %v427_v60 = vrot.slane %v426_v59, 1 }
 0xf19   :  { %vm428_vm4 = vcmp.lt.s32.totalorder %v426_v59, %v427_v60 }
 0xf1a   :  { %v429_v61 = vsel %vm428_vm4, %v426_v59, %v427_v60 }
 0xf1b   :  { %520 = vpush %v429_v61 }
 0xf4c   :  { %s521_s7 = spop %520 }
 0xf4d   :  { %v431_v62 = vstv %s521_s7 }
 0xf4e   :  { %vm432_vm5 = vcmp.eq.s32.totalorder %v403_v42, %v431_v62  ;;  %vm433_vm7 = vcmp.eq.s32.totalorder %v404_v43, %v431_v62 }
 0xf4f   :  { %vm436_vm15 = vmand %vm432_vm5, %vm434_vm13 }
 0xf50   :  { %vm437_vm8 = vmand %vm433_vm7, %vm435_vm14  ;;  %v440_v63 = vsel %vm436_vm15, 2048, %v403_v42 }
 0xf51   :  { %vm793_vm12 = vmor %vm401_vm2, %vm436_vm15  ;;  %v441_v1 = vsel %vm437_vm8, 2048, %v404_v43  ;;  %vm471_vm4 = vcmp.lt.s32.totalorder %v440_v63, 2048 }
 0xf52   :  { %vm802_vm6 = vmor %vm402_vm3, %vm437_vm8  ;;  %vm442_vm9 = vcmp.lt.s32.totalorder %v440_v63, %v441_v1  ;;  %vm472_vm5 = vcmp.lt.s32.totalorder %v441_v1, 2048 }
 0xf53   :  { %v443_v3 = vsel %vm442_vm9, %v440_v63, %v441_v1 }
 0xf54   :  { %v445_v4 = vshra.s32 %v443_v3, 16  ;;  %v444_v6 = vand.u32 65535, %v443_v3 }
 0xf56   :  { %v447_v5 = vcvt.s32.f32 %v445_v4  ;;  %v446_v8 = vcvt.s32.f32 %v444_v6 }
 0xf58   :  { %448 = vmin.xlane.f32.xlu0 %v447_v5 }
 0xfe1   :  { %v449_v7 = vpop.xlane.xlu0 %448 }
 0xfe2   :  { %vm450_vm10 = vcmp.eq.f32.partialorder %v447_v5, %v449_v7  ;;  %v455_v10 = vcvt.f32.s32 %v449_v7 }
 0xfe3   :  { %v451_v9 = vsel %vm450_vm10, %v446_v8, inf }
 0xfe4   :  { %452 = vmin.xlane.f32.xlu1 %v451_v9  ;;  %v456_v12 = vshll.u32 %v455_v10, 16 }
0x106d   :  { %v453_v11 = vpop.xlane.xlu1 %452 }
0x106e   :  { %v454_v13 = vcvt.f32.s32 %v453_v11 }
0x1070   :  { %v457_v14 = vadd.s32 %v456_v12, %v454_v13 }
0x1072   :  { %v458_v15 = vrot.slane %v457_v14, 4 }
0x1074   :  { %vm459_vm11 = vcmp.lt.s32.totalorder %v457_v14, %v458_v15 }
0x1075   :  { %v460_v16 = vsel %vm459_vm11, %v457_v14, %v458_v15 }
0x1076   :  { %v461_v17 = vrot.slane %v460_v16, 2 }
0x1078   :  { %vm462_vm0 = vcmp.lt.s32.totalorder %v460_v16, %v461_v17 }
0x1079   :  { %v463_v18 = vsel %vm462_vm0, %v460_v16, %v461_v17 }
0x107a   :  { %v464_v19 = vrot.slane %v463_v18, 1 }
0x107c   :  { %vm465_vm1 = vcmp.lt.s32.totalorder %v463_v18, %v464_v19 }
0x107d   :  { %v466_v20 = vsel %vm465_vm1, %v463_v18, %v464_v19 }
0x107e   :  { %522 = vpush %v466_v20 }
0x10af   :  { %s523_s8 = spop %522 }
0x10b0   :  { %v468_v21 = vstv %s523_s8 }
0x10b1   :  { %vm469_vm2 = vcmp.eq.s32.totalorder %v440_v63, %v468_v21  ;;  %vm470_vm3 = vcmp.eq.s32.totalorder %v441_v1, %v468_v21 }
0x10b2   :  { %vm473_vm7 = vmand %vm469_vm2, %vm471_vm4 }
0x10b3   :  { %vm474_vm13 = vmand %vm470_vm3, %vm472_vm5 }
0x10b4   :  { %vm475_vm14 = vmor %vm793_vm12, %vm473_vm7 }
0x10b5   :  { %vm476_vm15 = vmor %vm802_vm6, %vm474_vm13  ;;  %v479_v24 = vsel %vm475_vm14, 1.0, %v477_v22 }
0x10b6   :  { %v480_v25 = vsel %vm476_vm15, 1.0, %v478_v23  ;;  %481 = vst [vmem:[#allocation5] sm:$0xff] %v479_v24 }
0x10b7   :  { %482 = vst [vmem:[#allocation5 + $0x8] sm:$0xff] %v480_v25 }
0x10b8   :  { %559 = shalt.err (!%p556_p9)
}
0x10b9   :  { %494 = dma.vmem_to_hbm [thread:$0]  %s489_s10, 256, %s819_s3, [#allocation4], %s573_s15, %s573_s15, %s574_s16  }
0x10ba   :  { %570 = dma.done.wait [#allocation4], 256  }
0x10bb   :  { %571 = vsyncadd [#allocation4], 4294967040 }
0x10bc   :  { %498 = vsyncpa [#allocation3], 1 }
0x10bd   :  { %499 = vsyncpa [#allocation4], 1 }

</bundles_post_ra>
